<compile_context>
chip_gen: v6e
topology: v6e:2x2x1
jax: 0.10.0
libtpu: 0.0.40
codegen_flags: <defaults>
</compile_context>

<pallas_src>
import functools
import math

import jax
import jax.numpy as jnp
from jax.experimental import pallas as pl
from jax.experimental.pallas import tpu as pltpu


def _conv3x3_kernel(x_ref, w_ref, b_ref, o_ref, *, img_w, tile_hw):
    # x_ref : (1, 1, 3*Cin, (R+2)*W)  row-halo slab; kx shifts fused into the channel
    #                                  axis, rows flattened into the lane axis (stride W).
    # w_ref : (3, Cout, 3*Cin)         one fused (kx, Cin) weight matrix per ky.
    # b_ref : (Cout, 1)                f32 bias.
    # o_ref : (1, Cout, R*W)           lane-dense store (R*W % 128 == 0).
    x = x_ref[0, 0]                                            # (3*Cin, (R+2)*W)
    # ky row shifts = constant lane offsets of ky*W on the flattened slab.
    acc = jnp.dot(w_ref[0], x[:, :tile_hw],
                  preferred_element_type=jnp.float32)
    acc += jnp.dot(w_ref[1], x[:, img_w:img_w + tile_hw],
                   preferred_element_type=jnp.float32)
    acc += jnp.dot(w_ref[2], x[:, 2 * img_w:2 * img_w + tile_hw],
                   preferred_element_type=jnp.float32)
    o_ref[0] = (acc + b_ref[...]).astype(o_ref.dtype)


def _pick_tile_rows(H, W, Cin, Cout, in_bytes, out_bytes, n_batch, vmem_budget_bytes):
    """Row-tile height: rows*W % 128 == 0 (lane-dense), sized from a VMEM budget."""
    step = 128 // math.gcd(W, 128)       # smallest row count with rows*W % 128 == 0
    # resident bytes per output row: double-buffered slab + out tiles, the three
    # matmul rhs operand copies and the f32 accumulator.
    per_row = (5 * 3 * Cin * W * in_bytes          # 2x slab buffers + 3 rhs operands
               + Cout * W * (2 * out_bytes + 4))   # 2x out buffers + f32 accumulator
    budget_rows = max(step, (vmem_budget_bytes // per_row) // step * step)
    rows = min(budget_rows, pl.cdiv(H, step) * step)
    # Keep at least two spatial tiles when batch == 1 so both v7x TensorCores
    # (sharded over the "parallel" grid axes) get work.
    if n_batch == 1 and rows > step:
        half = pl.cdiv(pl.cdiv(H, 2), step) * step
        rows = min(rows, max(step, half))
    return rows


def conv3x3_pallas(x_nchw, weight, bias, *, use_refl=True, tile_rows=None,
                   compute_dtype=jnp.bfloat16, out_dtype=None,
                   vmem_budget_bytes=24 * 1024 * 1024):
    """Forward of Conv3x3 (ReflectionPad2d(1)/ZeroPad2d(1) + Conv2d(k=3), stride 1).

    x_nchw : (N, Cin, H, W)    float32   (reflect mode requires H, W >= 2, as in torch)
    weight : (Cout, Cin, 3, 3) float32   (PyTorch Conv2d layout)
    bias   : (Cout,)           float32
    returns (N, Cout, H, W)    out_dtype (defaults to x.dtype)
    """
    N, Cin, H, W = x_nchw.shape
    Cout = weight.shape[0]
    if out_dtype is None:
        out_dtype = x_nchw.dtype
    in_bytes = jnp.dtype(compute_dtype).itemsize
    out_bytes = jnp.dtype(out_dtype).itemsize

    if tile_rows is None:
        tile_rows = _pick_tile_rows(H, W, Cin, Cout, in_bytes, out_bytes, N,
                                    vmem_budget_bytes)
    R = tile_rows
    assert (R * W) % 128 == 0, (R, W)

    H_pad = pl.cdiv(H, R) * R
    n_tiles = H_pad // R
    tile_hw = R * W
    K = 3 * Cin

    pad_mode = "reflect" if use_refl else "constant"

    # ---- wrapper glue: cast first, pad, fuse kx shifts, per-tile row halos ----
    xb = x_nchw.astype(compute_dtype)                               # cast BEFORE pad/concat
    xp = jnp.pad(xb, ((0, 0), (0, 0), (1, 1), (1, 1)), mode=pad_mode)  # (N,Cin,H+2,W+2)
    # Fuse the three kx column shifts into the channel axis: channel = kx*Cin + c.
    x3 = jnp.concatenate([xp[:, :, :, kx:kx + W] for kx in range(3)], axis=1)
    if H_pad > H:  # extra zero rows at the bottom; their outputs are sliced off.
        x3 = jnp.pad(x3, ((0, 0), (0, 0), (0, H_pad - H), (0, 0)))
    # Per-row-tile slabs with a 2-row halo, rows flattened into the lane axis.
    slabs = jnp.stack([x3[:, :, t * R:t * R + R + 2, :] for t in range(n_tiles)],
                      axis=1)                                       # (N,T,3Cin,R+2,W)
    slabs = slabs.reshape(N, n_tiles, K, (R + 2) * W)

    # Weights: w3[ky, o, kx*Cin + c] = weight[o, c, ky, kx]  (matches x3 channel packing).
    w3 = jnp.transpose(weight, (2, 0, 3, 1)).reshape(3, Cout, K).astype(compute_dtype)
    b2 = bias.reshape(Cout, 1).astype(jnp.float32)

    flops = 2 * N * H * W * 9 * Cin * Cout
    bytes_accessed = (slabs.size * in_bytes + w3.size * in_bytes + b2.size * 4
                      + N * Cout * H_pad * W * out_bytes)

    kernel = functools.partial(_conv3x3_kernel, img_w=W, tile_hw=tile_hw)

    out_flat = pl.pallas_call(
        kernel,
        out_shape=jax.ShapeDtypeStruct((N, Cout, H_pad * W), out_dtype),
        grid_spec=pltpu.PrefetchScalarGridSpec(
            num_scalar_prefetch=0,
            grid=(N, n_tiles),
            in_specs=[
                pl.BlockSpec((1, 1, K, (R + 2) * W), lambda n, t: (n, t, 0, 0)),
                pl.BlockSpec((3, Cout, K), lambda n, t: (0, 0, 0)),
                pl.BlockSpec((Cout, 1), lambda n, t: (0, 0)),
            ],
            out_specs=pl.BlockSpec((1, Cout, tile_hw), lambda n, t: (n, 0, t)),
        ),
        compiler_params=pltpu.CompilerParams(
            dimension_semantics=("parallel", "parallel"),
            vmem_limit_bytes=48 * 1024 * 1024,
        ),
        cost_estimate=pl.CostEstimate(
            flops=flops, transcendentals=0, bytes_accessed=bytes_accessed),
    )(slabs, w3, b2)

    # (N, Cout, H_pad*W) is already NCHW memory order -> free reshape, slice off pad rows.
    out = out_flat.reshape(N, Cout, H_pad, W)
    if H_pad > H:
        out = out[:, :, :H, :]
    return out


def _reference_conv3x3(x_nchw, weight, bias, *, use_refl=True):
    pad_mode = "reflect" if use_refl else "constant"
    x_pad = jnp.pad(x_nchw, ((0, 0), (0, 0), (1, 1), (1, 1)), mode=pad_mode)
    out = jax.lax.conv_general_dilated(
        x_pad, weight, window_strides=(1, 1), padding="VALID",
        dimension_numbers=("NCHW", "OIHW", "NCHW"))
    return out + bias[None, :, None, None]


if __name__ == "__main__":
    key = jax.random.PRNGKey(0)
    k_x, k_w, k_b, k_x2 = jax.random.split(key, 4)

    N, Cin, Cout, H, W = 2, 4, 8, 16, 16
    x = jax.random.normal(k_x, (N, Cin, H, W), dtype=jnp.float32)
    fan_in = Cin * 9
    weight = jax.random.normal(k_w, (Cout, Cin, 3, 3), dtype=jnp.float32) / jnp.sqrt(fan_in)
    bias = jax.random.normal(k_b, (Cout,), dtype=jnp.float32) * 0.01

    ref = _reference_conv3x3(x, weight, bias, use_refl=True)

    # f32 compute path: validates the fused-tap kernel math exactly.
    out_f32 = jax.block_until_ready(
        conv3x3_pallas(x, weight, bias, use_refl=True, compute_dtype=jnp.float32))
    assert out_f32.shape == (N, Cout, H, W)
    assert jnp.allclose(out_f32, ref, atol=1e-4, rtol=1e-4)

    # Default bf16-operand / f32-accumulate path.
    out_bf = jax.block_until_ready(conv3x3_pallas(x, weight, bias, use_refl=True))
    assert jnp.allclose(out_bf, ref, atol=5e-2, rtol=5e-2)

    # Multi-row-tile spatial grid (tile_rows=8 -> 2 spatial tiles) with bf16 output.
    out_t = jax.block_until_ready(
        conv3x3_pallas(x, weight, bias, use_refl=True, tile_rows=8,
                       out_dtype=jnp.bfloat16))
    assert out_t.dtype == jnp.bfloat16
    assert jnp.allclose(out_t.astype(jnp.float32), ref, atol=1e-1, rtol=1e-1)

    # ZeroPad2d variant (use_refl=False).
    ref_zero = _reference_conv3x3(x, weight, bias, use_refl=False)
    out_zero = jax.block_until_ready(conv3x3_pallas(x, weight, bias, use_refl=False))
    assert jnp.allclose(out_zero, ref_zero, atol=5e-2, rtol=5e-2)

    # Odd spatial shape: exercises row padding (H_pad > H) and a non-16 width.
    H2, W2 = 13, 20
    x2 = jax.random.normal(k_x2, (1, Cin, H2, W2), dtype=jnp.float32)
    ref2 = _reference_conv3x3(x2, weight, bias, use_refl=True)
    out2 = jax.block_until_ready(
        conv3x3_pallas(x2, weight, bias, use_refl=True, compute_dtype=jnp.float32))
    assert out2.shape == (1, Cout, H2, W2)
    assert jnp.allclose(out2, ref2, atol=1e-4, rtol=1e-4)

    print("KERNEL_OK")
</pallas_src>

<mosaic_0001>
module attributes {stable_mosaic.version = 11 : i64} {
  func.func @_conv3x3_kernel(%arg0: i32, %arg1: i32, %arg2: memref<1x1x12x288xf32, #tpu.memory_space<vmem>>, %arg3: memref<3x8x12xf32, #tpu.memory_space<vmem>>, %arg4: memref<8x1xf32, #tpu.memory_space<vmem>>, %arg5: memref<1x8x256xf32, #tpu.memory_space<vmem>>) attributes {dimension_semantics = [#tpu.dimension_semantics<parallel>, #tpu.dimension_semantics<parallel>], iteration_bounds = array<i64: 2, 1>, scalar_prefetch = 0 : i64, scratch_operands = 0 : i64, tpu.core_type = #tpu.core_type<tc>, window_params = [{transform_indices = @transform_0, window_bounds = array<i64: 1, 1, 12, 288>}, {pipeline_mode = #tpu.pipeline_mode<synchronous>, transform_indices = @transform_1, window_bounds = array<i64: 3, 8, 12>}, {pipeline_mode = #tpu.pipeline_mode<synchronous>, transform_indices = @transform_2, window_bounds = array<i64: 8, 1>}, {transform_indices = @transform_3, window_bounds = array<i64: 1, 8, 256>}]} {
    %c0 = arith.constant 0 : index
    %c0_0 = arith.constant 0 : index
    %c0_1 = arith.constant 0 : index
    %c0_2 = arith.constant 0 : index
    %0 = vector.load %arg2[%c0, %c0_0, %c0_1, %c0_2] : memref<1x1x12x288xf32, #tpu.memory_space<vmem>>, vector<1x1x12x288xf32>
    %1 = vector.shape_cast %0 : vector<1x1x12x288xf32> to vector<12x288xf32>
    %c0_3 = arith.constant 0 : index
    %c0_4 = arith.constant 0 : index
    %c0_5 = arith.constant 0 : index
    %2 = vector.load %arg3[%c0_3, %c0_4, %c0_5] : memref<3x8x12xf32, #tpu.memory_space<vmem>>, vector<1x8x12xf32>
    %3 = vector.shape_cast %2 : vector<1x8x12xf32> to vector<8x12xf32>
    %4 = vector.extract_strided_slice %1 {offsets = [0, 0], sizes = [12, 256], strides = [1, 1]} : vector<12x288xf32> to vector<12x256xf32>
    %cst = arith.constant dense<0.000000e+00> : vector<8x256xf32>
    %5 = tpu.matmul %3, %4, %cst {dimension_numbers = #tpu.dot_dimension_numbers<[1], [0], [0], [1], [0, 0, 1, 1], [], []>} : vector<8x12xf32>, vector<12x256xf32>, vector<8x256xf32> -> vector<8x256xf32>
    %c1 = arith.constant 1 : index
    %c0_6 = arith.constant 0 : index
    %c0_7 = arith.constant 0 : index
    %6 = vector.load %arg3[%c1, %c0_6, %c0_7] : memref<3x8x12xf32, #tpu.memory_space<vmem>>, vector<1x8x12xf32>
    %7 = vector.shape_cast %6 : vector<1x8x12xf32> to vector<8x12xf32>
    %8 = vector.extract_strided_slice %1 {offsets = [0, 16], sizes = [12, 256], strides = [1, 1]} : vector<12x288xf32> to vector<12x256xf32>
    %cst_8 = arith.constant dense<0.000000e+00> : vector<8x256xf32>
    %9 = tpu.matmul %7, %8, %cst_8 {dimension_numbers = #tpu.dot_dimension_numbers<[1], [0], [0], [1], [0, 0, 1, 1], [], []>} : vector<8x12xf32>, vector<12x256xf32>, vector<8x256xf32> -> vector<8x256xf32>
    %10 = arith.addf %5, %9 : vector<8x256xf32>
    %c2 = arith.constant 2 : index
    %c0_9 = arith.constant 0 : index
    %c0_10 = arith.constant 0 : index
    %11 = vector.load %arg3[%c2, %c0_9, %c0_10] : memref<3x8x12xf32, #tpu.memory_space<vmem>>, vector<1x8x12xf32>
    %12 = vector.shape_cast %11 : vector<1x8x12xf32> to vector<8x12xf32>
    %13 = vector.extract_strided_slice %1 {offsets = [0, 32], sizes = [12, 256], strides = [1, 1]} : vector<12x288xf32> to vector<12x256xf32>
    %cst_11 = arith.constant dense<0.000000e+00> : vector<8x256xf32>
    %14 = tpu.matmul %12, %13, %cst_11 {dimension_numbers = #tpu.dot_dimension_numbers<[1], [0], [0], [1], [0, 0, 1, 1], [], []>} : vector<8x12xf32>, vector<12x256xf32>, vector<8x256xf32> -> vector<8x256xf32>
    %15 = arith.addf %10, %14 : vector<8x256xf32>
    %c0_12 = arith.constant 0 : index
    %c0_13 = arith.constant 0 : index
    %16 = vector.load %arg4[%c0_12, %c0_13] : memref<8x1xf32, #tpu.memory_space<vmem>>, vector<8x1xf32>
    %17 = vector.broadcast %16 : vector<8x1xf32> to vector<8x256xf32>
    %18 = arith.addf %15, %17 : vector<8x256xf32>
    %c0_14 = arith.constant 0 : index
    %c0_15 = arith.constant 0 : index
    %c0_16 = arith.constant 0 : index
    %19 = vector.load %arg5[%c0_14, %c0_15, %c0_16] : memref<1x8x256xf32, #tpu.memory_space<vmem>>, vector<1x8x256xf32>
    %20 = vector.shape_cast %19 : vector<1x8x256xf32> to vector<8x256xf32>
    %21 = vector.shape_cast %18 : vector<8x256xf32> to vector<1x8x256xf32>
    tpu.vector_store %arg5[%c0_14, %c0_15, %c0_16], %21 {strides = array<i32>} : memref<1x8x256xf32, #tpu.memory_space<vmem>>, vector<1x8x256xf32>,
    return
  }
  func.func @transform_0(%arg0: i32, %arg1: i32) -> (i32, i32, i32, i32) {
    %c0_i32 = arith.constant 0 : i32
    %c0_i32_0 = arith.constant 0 : i32
    %c0_i32_1 = arith.constant 0 : i32
    return %arg0, %arg1, %c0_i32, %c0_i32_0 : i32, i32, i32, i32
  }
  func.func @transform_1(%arg0: i32, %arg1: i32) -> (i32, i32, i32) {
    %c0_i32 = arith.constant 0 : i32
    %c0_i32_0 = arith.constant 0 : i32
    %c0_i32_1 = arith.constant 0 : i32
    %c0_i32_2 = arith.constant 0 : i32
    return %c0_i32, %c0_i32_0, %c0_i32_1 : i32, i32, i32
  }
  func.func @transform_2(%arg0: i32, %arg1: i32) -> (i32, i32) {
    %c0_i32 = arith.constant 0 : i32
    %c0_i32_0 = arith.constant 0 : i32
    %c0_i32_1 = arith.constant 0 : i32
    return %c0_i32, %c0_i32_0 : i32, i32
  }
  func.func @transform_3(%arg0: i32, %arg1: i32) -> (i32, i32, i32) {
    %c0_i32 = arith.constant 0 : i32
    %c0_i32_0 = arith.constant 0 : i32
    return %arg0, %c0_i32, %arg1 : i32, i32, i32
  }
}

</mosaic_0001>

<bundles_post_ra>
// kernel: tpu_custom_call.1
= control target key start
LH: loop header
LB: loop body
LE: loop exit
PB: predicated region body
PF: predicated region fallthrough
CT: control target
= control target key end

     0   :  { %8 = vsyncpa [#allocation3], 0  ;;  %s905_s0 = inlined_call_operand.vmem [shape: f32[2,1,12,288], index: 0, kind: input, shape index: {}]   ;;  %s906_s1 = inlined_call_operand.vmem [shape: f32[3,8,12], index: 1, kind: input, shape index: {}]   ;;  %s907_s2 = inlined_call_operand.vmem [shape: f32[8,1], index: 2, kind: input, shape index: {}]   ;;  %s908_s3 = inlined_call_operand.hbm [shape: f32[2,8,256], index: 3, kind: output, shape index: {}]  }
   0x1   :  { %10 = vsyncpa [#allocation3 + $0x1], 0  ;;  %s785_s12 = smov 0   ;;  %s787_s13 = smov 0  }
   0x2   :  { %s789_s14 = smov 0   ;;  %s791_s15 = smov 0  }
   0x3   :  { %s793_s16 = smov 0   ;;  %s795_s17 = smov 0  }
   0x4 LB: > { %s597_s18 = sadd.s32 4294967295, %s758_s17   ;;  %s598_s19 = sadd.s32 4294967294, %s758_s17   ;;  %s758_s17 = sphi %s795_s17, %s16_s17   ;;  %s754_s16 = sphi %s793_s16, %s915_s16   ;;  %s750_s15 = sphi %s791_s15, %s914_s15   ;;  %s746_s14 = sphi %s789_s14, %s913_s14   ;;  %s742_s13 = sphi %s787_s13, %s912_s13   ;;  %s738_s12 = sphi %s785_s12, %s911_s12  }
   0x5   : > { %s28_s20 = sadd.s32 1, %s754_s16  ;;  %s107_s21 = sadd.s32 1, %s746_s14 }
   0x6   : > { %p30_p0 = scmp.ge.s32.totalorder %s28_s20, 2  ;;  %p117_p1 = scmp.ne.s32.totalorder %s746_s14, %s742_s13 }
   0x7   : > { %p118_p2 = scmp.eq.s32.totalorder %s597_s18, 1  ;;  %p123_p3 = scmp.ne.s32.totalorder %s742_s13, %s738_s12 }
   0x8   : > { %s917_s20 = smov (%p30_p0, %s28_s20), 0  ;;  %p124_p5 = scmp.eq.s32.totalorder %s598_s19, 1 }
   0x9   : > { %p825_p4 = por %p118_p2, %p117_p1  ;;  %s102_s23 = ssub.s32 %s754_s16, %s917_s20 }
   0xa   : > { %p601_p6 = scmp.ge.s32.totalorder %s758_s17, 1  ;;  %p105_p7 = scmp.eq.s32.totalorder %s102_s23, 0 }
   0xb   : > { %p832_p8 = por %p124_p5, %p123_p3  ;;  %p160_p9 = scmp.lt.s32.totalorder %s758_s17, 3 }
   0xc   : > { %s838_s25 = scalar_select %p105_p7, %s746_s14, %s107_s21  }
   0xd   : > { %p161_p10 = pnand %p601_p6, %p160_p9 }
   0xe   : > { %p188_p11 = scmp.lt.s32.totalorder (!%p161_p10), %s750_s15, 1  ;;  %s760_s4 = smov (!%p161_p10), 112  }
   0xf   : > { %164 = sbr.rel (%p161_p10) target bundleno = 376 (0x178), region = 32  ;;  %s763_s7 = smov (!%p161_p10), 96  }
  0x10   : > { %s185_s21 = sand.u32 (!%p161_p10), 1, %s742_s13  }
  0x11   : > { %s602_s23 = sshll.u32 (!%p161_p10), %s185_s21, 4  ;;  %s502_s5 = scalar_lea.sflag (!%p161_p10), [#allocation3], %s185_s21 }
  0x14   : > { %s189_s26 = scalar_select %p188_p11, %s750_s15, 1  ;;  %vm236_vm0 = vcmask 1043456   ;;  %v761_v4 = vmov 0.0   ;;  %vm232_vm1 = vcmask 97280   ;;  %v204_v5 = vld [vmem:[%s906_s1] sm:$0xff]  ;;  %v762_v8 = vmov 0  }
  0x15   : > { %305 = vmatprep.mubr.f32.mxu0 %v761_v4  ;;  %383 = vmatprep.mubr.f32.mxu1 %v761_v4  ;;  %v491_v9 = vld [vmem:[%s907_s2] sm:$0xff]  ;;  %vm225_vm2 = vcmask 916480   ;;  %v604_v20 = vld [vmem:[%s906_s1 + $0x8] sm:$0xff]  ;;  %vm404_vm3 = vcmask 785408   ;;  %v611_v31 = vld [vmem:[%s906_s1 + $0x10] sm:$0xff] }
  0x16   : > { %s621_s27 = smul.u32 48, %s189_s26  ;;  %681 = vset.pattern.permute.xlu0 %v762_v8  ;;  %s620_s26 = sshll.u32 %s750_s15, 8 }
  0x18   : > { %s196_s30 = scalar_lea.vmem %s905_s0, %s621_s27  ;;  %s187_s27 = scalar_lea.vmem [#allocation2], %s602_s23 }
  0x19   : > { %v202_v0 = vld [vmem:[%s196_s30 + $0x20] sm:$0xf]  ;;  %v201_v1 = vld [vmem:[%s196_s30 + $0x18] sm:$0xf]  ;;  %v203_v2 = vld [vmem:[%s196_s30 + $0x28] sm:$0xf] }
  0x1a   : > { %221 = vrot.lane.b32.xlu0 %v202_v0, %s760_s4  ;;  %219 = vrot.lane.b32.xlu1 %v201_v1, %s760_s4  ;;  %v199_v3 = vld [vmem:[%s196_s30 + $0x8] sm:$0xff]  ;;  %v198_v6 = vld [vmem:[%s196_s30] sm:$0xff]  ;;  %s518_s28 = sshll.u32 %s187_s27, 4  ;;  %s519_s28 = int_to_ptr.vmem [resolvable:$true] %s518_s28 }
  0x1b   : > { %608 = vmatprep.subr.msk.mxu1 %vm236_vm0, %v202_v0  ;;  %v200_v7 = vld [vmem:[%s196_s30 + $0x10] sm:$0xff]  ;;  %s682_s6 = scalar_lea.vmem %s519_s28, 256 }
  0x1c   : > { %609 = vmatpush1.msk.msra.mxu1 %vm236_vm0, %v201_v1  ;;  %p683_p12 = scmp.ne.s32.totalorder %s519_s28, %s682_s6 }
  0x1d   : > { %349 = vmatprep.subr.mxu1 %v199_v3 }
  0x1e   : > { %223 = vrot.lane.b32.xlu0 %v203_v2, %s760_s4  ;;  %215 = vrot.lane.b32.xlu1 %v199_v3, %s760_s4  ;;  %p684_p13 = pnand %p683_p12, %p825_p4 }
  0x1f   : > { %350 = vmatpush1.msra.mxu1 %v198_v6 }
  0x20   : > { %610 = vmatmul.mubr.msk.f32.vlgmr.msra.gmra.mxu1 %vm232_vm1, %v204_v5  ;;  %p685_p0 = pneg %p684_p13 }
  0x22   : > { %217 = vrot.lane.b32.xlu0 %v200_v7, %s760_s4  ;;  %213 = vrot.lane.b32.xlu1 %v198_v6, %s760_s4  ;;  %s516_s4 = scalar_lea.hbm %s908_s3, %s620_s26 }
  0x26   : > { %400 = vrot.lane.b32.xlu0 %v202_v0, %s763_s7  ;;  %402 = vrot.lane.b32.xlu1 %v203_v2, %s763_s7 }
  0x2a   : > { %398 = vrot.lane.b32.xlu0 %v201_v1, %s763_s7  ;;  %394 = vrot.lane.b32.xlu1 %v199_v3, %s763_s7 }
  0x2e   : > { %396 = vrot.lane.b32.xlu0 %v200_v7, %s763_s7  ;;  %392 = vrot.lane.b32.xlu1 %v198_v6, %s763_s7  ;;  %s764_s7 = smov [#allocation2]  }
  0x2f   : > { %s686_s15 = sshll.u32 %s764_s7, 4  ;;  %s687_s15 = int_to_ptr.vmem [resolvable:$false] %s686_s15 }
  0x30   : > { %s688_s8 = scalar_lea.vmem %s687_s15, 512  ;;  %p689_p1 = scmp.lt.s32.totalorder %s519_s28, %s687_s15 }
  0x31   : > { %p690_p2 = scmp.lt.s32.totalorder %s688_s8, %s682_s6 }
  0x32   : > { %494 = vperm.xlu0 %681, %v491_v9  }
  0x33   : > { %p691_p3 = por %p690_p2, %p689_p1 }
  0x35   : > { %p692_p5 = pnand %p691_p3, %p685_p0 }
  0x8c   : > { %v222_v10 = vpop.permute.xlu0 %221  ;;  %v220_v11 = vpop.permute.xlu1 %219 }
  0x8d   : > { %v228_v15 = vsel %vm225_vm2, %v220_v11, %v222_v10 }
  0x90   : > { %v224_v12 = vpop.permute.xlu0 %223  ;;  %v216_v13 = vpop.permute.xlu1 %215 }
  0x91   : > { %v229_v14 = vsel %vm225_vm2, %v222_v10, %v224_v12 }
  0x92   : > { %605 = vmatprep.subr.msk.mxu0 %vm236_vm0, %v229_v14 }
  0x93   : > { %606 = vmatpush1.msk.msra.mxu0 %vm236_vm0, %v228_v15 }
  0x94   : > { %v218_v16 = vpop.permute.xlu0 %217  ;;  %v214_v17 = vpop.permute.xlu1 %213 }
  0x95   : > { %v227_v18 = vsel %vm225_vm2, %v216_v13, %v218_v16  ;;  %v226_v19 = vsel %vm225_vm2, %v214_v17, %v216_v13 }
  0x96   : > { %271 = vmatprep.subr.mxu0 %v227_v18 }
  0x97   : > { %272 = vmatpush1.msra.mxu0 %v226_v19 }
  0x98   : > { %v401_v21 = vpop.permute.xlu0 %400  ;;  %v403_v22 = vpop.permute.xlu1 %402  ;;  %607 = vmatmul.mubr.msk.f32.vlgmr.msra.gmra.mxu0 %vm232_vm1, %v604_v20 }
  0x99   : > { %v408_v23 = vsel %vm404_vm3, %v401_v21, %v403_v22  ;;  %482 = vmatprep.mubr.f32.mxu0 %v761_v4 }
  0x9a   : > { %612 = vmatprep.subr.msk.mxu0 %vm236_vm0, %v408_v23 }
  0x9c   : > { %v399_v24 = vpop.permute.xlu0 %398  ;;  %v395_v25 = vpop.permute.xlu1 %394 }
  0x9d   : > { %v407_v26 = vsel %vm404_vm3, %v399_v24, %v401_v21 }
  0x9e   : > { %613 = vmatpush1.msk.msra.mxu0 %vm236_vm0, %v407_v26 }
  0xa0   : > { %v397_v27 = vpop.permute.xlu0 %396  ;;  %v393_v28 = vpop.permute.xlu1 %392 }
  0xa1   : > { %v405_v29 = vsel %vm404_vm3, %v393_v28, %v395_v25  ;;  %v406_v30 = vsel %vm404_vm3, %v395_v25, %v397_v27 }
  0xa2   : > { %448 = vmatprep.subr.mxu0 %v406_v30 }
  0xa3   : > { %449 = vmatpush1.msra.mxu0 %v405_v29 }
  0xa4   : > { %614 = vmatmul.mubr.msk.f32.vlgmr.msra.gmra.mxu0 %vm232_vm1, %v611_v31 }
  0xad   : > { %v495_v38 = vpop.permute.xlu0 %494 }
  0xe0   : > { %v385_v33 = vpop.f32.mrf.mxu1 }
  0xe2   : > { %v387_v35 = vpop.f32.mrf.mxu1 }
 0x158   : > { %v307_v32 = vpop.f32.mrf.mxu0 }
 0x159   : > { %v386_v36 = vadd.f32 %v385_v33, %v307_v32 }
 0x15a   : > { %v309_v34 = vpop.f32.mrf.mxu0 }
 0x15b   : > { %v388_v39 = vadd.f32 %v387_v35, %v309_v34 }
 0x164   : > { %v484_v37 = vpop.f32.mrf.mxu0 }
 0x165   : > { %v489_v40 = vadd.f32 %v484_v37, %v386_v36 }
 0x166   : > { %v486_v41 = vpop.f32.mrf.mxu0 }
 0x167   : > { %v497_v42 = vadd.f32 %v495_v38, %v489_v40  ;;  %v490_v43 = vadd.f32 %v486_v41, %v388_v39 }
 0x169   : > { %499 = vst [vmem:[%s187_s27] sm:$0xff] %v497_v42  ;;  %v498_v44 = vadd.f32 %v495_v38, %v490_v43 }
 0x16b   : > { %500 = vst [vmem:[%s187_s27 + $0x8] sm:$0xff] %v498_v44 }
 0x16c   : > { %695 = shalt.err (!%p692_p5)
}
 0x16d   : > { %s696_s9 = scalar_lea.hbm %s516_s4, 256  ;;  %s700_s18 = scalar_lea.hbm %s908_s3, 512 }
 0x16e   : > { %p697_p6 = scmp.ne.s32.totalorder %s516_s4, %s696_s9  ;;  %p701_p10 = scmp.lt.s32.totalorder %s516_s4, %s908_s3 }
 0x16f   : > { %p702_p11 = scmp.lt.s32.totalorder %s700_s18, %s696_s9 }
 0x170   : > { %p698_p7 = pnand %p697_p6, %p825_p4 }
 0x171   : > { %p703_p12 = por %p702_p11, %p701_p10 }
 0x172   : > { %p699_p9 = pneg %p698_p7 }
 0x174   : > { %p704_p13 = pnand %p703_p12, %p699_p9 }
 0x176   : > { %707 = shalt.err (!%p704_p13)
}
 0x177   : > { %622 = dma.vmem_to_hbm [thread:$0]  (%p825_p4), %s519_s28, 256, %s516_s4, %s502_s5  }
 0x178 PF: > { %p628_p0 = scmp.ge.s32.totalorder %s758_s17, 2  ;;  %s530_s23 = sand.u32 1, %s738_s12  }
 0x179   : > { %s531_s26 = scalar_lea.sflag [#allocation3], %s530_s23 }
 0x17a   : > { %p625_p1 = pnand %p628_p0, %p832_p8 }
 0x17c   : > { %p626_p2 = pneg %p625_p1 }
 0x17e   : > { %733 = dma.done.wait (%p626_p2), %s531_s26, 256  }
 0x17f   : > { %735 = vsyncadd (%p626_p2), %s531_s26, 4294967040  ;;  %s16_s17 = sadd.s32 1, %s758_s17   ;;  %s911_s12 = smov %s742_s13 }
 0x180   : > { %p13_p3 = scmp.ge.s32.totalorder %s16_s17, 4   ;;  %s912_s13 = smov %s746_s14 }
 0x181   : > { %s913_s14 = smov %s838_s25  ;;  %s914_s15 = smov %s754_s16 }
 0x182   : > { %s915_s16 = smov %s917_s20  ;;  %15 = sbr.rel (!%p13_p3) target bundleno = 4 (0x4), region = 69 }
 0x187   :  { %536 = vsyncpa [#allocation3], 1 }
 0x188   :  { %538 = vsyncpa [#allocation3 + $0x1], 1 }

</bundles_post_ra>
